<compile_context>
chip_gen: v7x
topology: tpu7x:2x2x1
jax: 0.10.0
libtpu: 0.0.40
codegen_flags: <defaults>
</compile_context>

<pallas_src>
import jax
import jax.numpy as jnp
from jax.experimental import pallas as pl
from jax.experimental.pallas import tpu as pltpu


def _text_emb_kernel(ids_ref, tab_ref, w_ref, b_ref, o_ref):
    # ids_ref: (N, 1)  int32   token ids for this block (N = block_b * T)
    # tab_ref: (V, Hp) f32     embedding table (VMEM-resident, constant block index)
    # w_ref:   (1, Hp) f32     attention weight, lane-major
    # b_ref:   (1, 1)  f32     attention bias
    # o_ref:   (block_b, Hp)   pooled output block
    n = ids_ref.shape[0]
    bb, hp = o_ref.shape
    t = n // bb
    v = tab_ref.shape[0]

    # ---- fused embedding gather: one-hot (N, V) @ table (V, Hp) on the MXU -------
    ids = ids_ref[...]                                                   # (N, 1)
    onehot = (jax.lax.broadcasted_iota(jnp.int32, (n, v), 1) == ids)
    e = jnp.dot(onehot.astype(tab_ref.dtype), tab_ref[...],
                preferred_element_type=jnp.float32)                      # (N, Hp)

    # ---- attention scores: lane reduce (VPU + XLU), not an N=1 MXU matmul --------
    s = jnp.sum(e * w_ref[...], axis=-1, keepdims=True) + b_ref[0, 0]    # (N, 1)
    # tanh(s) is in (-1, 1)  =>  exp is overflow-safe without max subtraction.
    p = jnp.exp(jnp.tanh(s))                                             # (N, 1)

    # ---- per-batch-row softmax + weighted pooling via segment-selector matmul ----
    # seg[b, j] = 1 iff token j of this block belongs to local batch row b.
    rows = jax.lax.broadcasted_iota(jnp.int32, (bb, n), 0)
    cols = jax.lax.broadcasted_iota(jnp.int32, (bb, n), 1)
    seg = ((cols >= rows * t) & (cols < rows * t + t)).astype(jnp.float32)  # (bb, N)

    num = jnp.dot(seg, p * e, preferred_element_type=jnp.float32)        # (bb, Hp)
    den = jnp.dot(seg, p, preferred_element_type=jnp.float32)            # (bb, 1)

    r = pl.reciprocal(den, approx=True)      # EUP slot, effectively free
    r = r * (2.0 - den * r)                  # one Newton step -> f32 accuracy
    o_ref[...] = (num * r).astype(o_ref.dtype)


def _round_up(x, m):
    return (x + m - 1) // m * m


def _pick_block_b(B, T, V, Hp):
    """Largest batch block whose per-step working set stays a few MiB (safe on v5e/v6e/v7x)."""
    budget = 4 << 20                         # conservative vs 64 MiB VMEM on v7x
    per_row = T * (V + 2 * Hp + 8) * 4       # onehot + e + p*e (+ slack), f32
    bb = max(1, budget // per_row)
    if bb >= B:
        return B
    return max(8, (bb // 8) * 8)             # keep the output block sublane-aligned


def text_emb_forward(x, emb_weight, attn_w, attn_b, *, block_b=None):
    """x: (B, T) int token ids; emb_weight: (V, H); attn_w: (H, 1); attn_b: (1, 1).

    Returns attention-pooled embeddings of shape (B, H), float32.
    """
    B, T = x.shape
    V, H = emb_weight.shape

    # Pad H to a lane-dense multiple of 128 and V to a sublane multiple of 8.
    # Zero padding is exact: padded table columns contribute 0 to scores and output.
    Hp = _round_up(H, 128)
    Vp = _round_up(V, 8)
    table = emb_weight.astype(jnp.float32)
    if (Vp, Hp) != (V, H):
        table = jnp.pad(table, ((0, Vp - V), (0, Hp - H)))
    w_row = jnp.pad(attn_w.astype(jnp.float32).reshape(1, H), ((0, 0), (0, Hp - H)))  # (1, Hp)
    bias = attn_b.reshape(1, 1).astype(jnp.float32)

    if block_b is None:
        block_b = _pick_block_b(B, T, Vp, Hp)
    block_b = max(1, min(int(block_b), B))
    if block_b < B:
        # Sublane-align the batch block so every tile is (8k, 128m)-dense.
        block_b = max(8, (block_b // 8) * 8)

    # Pad the batch so the grid divides exactly (padded rows compute on id 0 and are sliced off).
    Bp = _round_up(B, block_b)
    ids = x.astype(jnp.int32).reshape(B * T, 1)
    if Bp != B:
        ids = jnp.pad(ids, ((0, (Bp - B) * T), (0, 0)))

    # TODO(synk): for vocabularies too large for a VMEM-resident table, replace the
    # fused one-hot gather with a manual double-buffered make_async_copy row gather.

    grid = (pl.cdiv(Bp, block_b),)
    out = pl.pallas_call(
        _text_emb_kernel,
        out_shape=jax.ShapeDtypeStruct((Bp, Hp), jnp.float32),
        grid_spec=pltpu.PrefetchScalarGridSpec(
            num_scalar_prefetch=0,
            grid=grid,
            in_specs=[
                pl.BlockSpec((block_b * T, 1), lambda i: (i, 0)),   # token ids
                pl.BlockSpec((Vp, Hp), lambda i: (0, 0)),           # table (resident)
                pl.BlockSpec((1, Hp), lambda i: (0, 0)),            # attn weight row
                pl.BlockSpec((1, 1), lambda i: (0, 0)),             # attn bias
            ],
            out_specs=pl.BlockSpec((block_b, Hp), lambda i: (i, 0)),
        ),
        compiler_params=pltpu.CompilerParams(
            dimension_semantics=("parallel",),   # shards batch blocks across TCs on v7x
        ),
    )(ids, table, w_row, bias)
    return out[:B, :H]


def _reference(x, emb_weight, attn_w, attn_b):
    e = jnp.take(emb_weight, x, axis=0)                           # (B, T, H)
    s = jnp.einsum("bth,ho->bto", e, attn_w) + attn_b[0, 0]       # (B, T, 1)
    a = jax.nn.softmax(jnp.tanh(s), axis=1)
    return jnp.sum(a * e, axis=1)


if __name__ == "__main__":
    key = jax.random.PRNGKey(0)
    k_w, k_aw, k_ab, k_x = jax.random.split(key, 4)

    V, H = 64, 32        # vocab size, hidden size (weight.shape)
    B, T = 16, 8         # batch, sequence length

    emb_weight = jax.random.normal(k_w, (V, H), dtype=jnp.float32) * 0.1
    attn_w = jax.random.normal(k_aw, (H, 1), dtype=jnp.float32) * 0.1
    attn_b = jax.random.normal(k_ab, (1, 1), dtype=jnp.float32) * 0.1
    x = jax.random.randint(k_x, (B, T), 0, V, dtype=jnp.int32)

    # block_b=8 -> 2 grid steps of 8 batch rows each.
    out = jax.block_until_ready(text_emb_forward(x, emb_weight, attn_w, attn_b, block_b=8))
    ref = jax.block_until_ready(_reference(x, emb_weight, attn_w, attn_b))

    assert out.shape == (B, H)
    # Tolerance covers the (Newton-refined) approx reciprocal and MXU f32 rounding.
    assert jnp.allclose(out, ref, atol=1e-4, rtol=1e-4), float(jnp.max(jnp.abs(out - ref)))

    # Also exercise the auto-tiled path with a batch that does not divide the block.
    x2 = jax.random.randint(key, (13, T), 0, V, dtype=jnp.int32)
    out2 = jax.block_until_ready(text_emb_forward(x2, emb_weight, attn_w, attn_b))
    ref2 = jax.block_until_ready(_reference(x2, emb_weight, attn_w, attn_b))
    assert out2.shape == (13, H)
    assert jnp.allclose(out2, ref2, atol=1e-4, rtol=1e-4), float(jnp.max(jnp.abs(out2 - ref2)))

    print("KERNEL_OK")
</pallas_src>

<mosaic_0001>
module attributes {stable_mosaic.version = 11 : i64} {
  func.func @_text_emb_kernel(%arg0: i32, %arg1: memref<64x1xi32, #tpu.memory_space<vmem>>, %arg2: memref<64x128xf32, #tpu.memory_space<vmem>>, %arg3: memref<1x128xf32, #tpu.memory_space<vmem>>, %arg4: memref<1x1xf32, #tpu.memory_space<vmem>>, %arg5: memref<8x128xf32, #tpu.memory_space<vmem>>) attributes {dimension_semantics = [#tpu.dimension_semantics<parallel>], iteration_bounds = array<i64: 2>, scalar_prefetch = 0 : i64, scratch_operands = 0 : i64, tpu.core_type = #tpu.core_type<tc>, window_params = [{transform_indices = @transform_0, window_bounds = array<i64: 64, 1>}, {pipeline_mode = #tpu.pipeline_mode<synchronous>, transform_indices = @transform_1, window_bounds = array<i64: 64, 128>}, {pipeline_mode = #tpu.pipeline_mode<synchronous>, transform_indices = @transform_2, window_bounds = array<i64: 1, 128>}, {pipeline_mode = #tpu.pipeline_mode<synchronous>, transform_indices = @transform_3, window_bounds = array<i64: 1, 1>}, {transform_indices = @transform_4, window_bounds = array<i64: 8, 128>}]} {
    %c0 = arith.constant 0 : index
    %c0_0 = arith.constant 0 : index
    %0 = vector.load %arg1[%c0, %c0_0] : memref<64x1xi32, #tpu.memory_space<vmem>>, vector<64x1xi32>
    %1 = tpu.iota {dimensions = array<i32: 1>} : vector<64x64xi32>
    %2 = vector.broadcast %0 : vector<64x1xi32> to vector<64x64xi32>
    %3 = arith.cmpi eq, %1, %2 : vector<64x64xi32>
    %4 = arith.extui %3 : vector<64x64xi1> to vector<64x64xi32>
    %5 = arith.sitofp %4 : vector<64x64xi32> to vector<64x64xf32>
    %c0_1 = arith.constant 0 : index
    %c0_2 = arith.constant 0 : index
    %6 = vector.load %arg2[%c0_1, %c0_2] : memref<64x128xf32, #tpu.memory_space<vmem>>, vector<64x128xf32>
    %cst = arith.constant dense<0.000000e+00> : vector<64x128xf32>
    %7 = tpu.matmul %5, %6, %cst {dimension_numbers = #tpu.dot_dimension_numbers<[1], [0], [0], [1], [0, 0, 1, 1], [], []>} : vector<64x64xf32>, vector<64x128xf32>, vector<64x128xf32> -> vector<64x128xf32>
    %c0_3 = arith.constant 0 : index
    %c0_4 = arith.constant 0 : index
    %8 = vector.load %arg3[%c0_3, %c0_4] : memref<1x128xf32, #tpu.memory_space<vmem>>, vector<1x128xf32>
    %9 = vector.broadcast %8 : vector<1x128xf32> to vector<64x128xf32>
    %10 = arith.mulf %7, %9 : vector<64x128xf32>
    %cst_5 = arith.constant dense<0.000000e+00> : vector<64xf32>
    %11 = vector.multi_reduction <add>, %10, %cst_5 [1] : vector<64x128xf32> to vector<64xf32>
    %12 = vector.shape_cast %11 : vector<64xf32> to vector<64x1xf32>
    %c0_6 = arith.constant 0 : index
    %c0_7 = arith.constant 0 : index
    %13 = vector.load %arg4[%c0_6, %c0_7] : memref<1x1xf32, #tpu.memory_space<vmem>>, vector<1x1xf32>
    %14 = vector.extract %13[0, 0] : f32 from vector<1x1xf32>
    %15 = vector.broadcast %14 : f32 to vector<64x1xf32>
    %16 = arith.addf %12, %15 : vector<64x1xf32>
    %17 = math.tanh %16 : vector<64x1xf32>
    %18 = math.exp %17 : vector<64x1xf32>
    %19 = tpu.iota {dimensions = array<i32: 0>} : vector<8x64xi32>
    %20 = tpu.iota {dimensions = array<i32: 1>} : vector<8x64xi32>
    %c8_i32 = arith.constant 8 : i32
    %21 = vector.broadcast %c8_i32 : i32 to vector<8x64xi32>
    %22 = arith.muli %19, %21 : vector<8x64xi32>
    %23 = arith.cmpi sge, %20, %22 : vector<8x64xi32>
    %c8_i32_8 = arith.constant 8 : i32
    %24 = vector.broadcast %c8_i32_8 : i32 to vector<8x64xi32>
    %25 = arith.muli %19, %24 : vector<8x64xi32>
    %c8_i32_9 = arith.constant 8 : i32
    %26 = vector.broadcast %c8_i32_9 : i32 to vector<8x64xi32>
    %27 = arith.addi %25, %26 : vector<8x64xi32>
    %28 = arith.cmpi slt, %20, %27 : vector<8x64xi32>
    %29 = arith.andi %23, %28 : vector<8x64xi1>
    %30 = arith.extui %29 : vector<8x64xi1> to vector<8x64xi32>
    %31 = arith.sitofp %30 : vector<8x64xi32> to vector<8x64xf32>
    %32 = vector.broadcast %18 : vector<64x1xf32> to vector<64x128xf32>
    %33 = arith.mulf %32, %7 : vector<64x128xf32>
    %cst_10 = arith.constant dense<0.000000e+00> : vector<8x128xf32>
    %34 = tpu.matmul %31, %33, %cst_10 {dimension_numbers = #tpu.dot_dimension_numbers<[1], [0], [0], [1], [0, 0, 1, 1], [], []>} : vector<8x64xf32>, vector<64x128xf32>, vector<8x128xf32> -> vector<8x128xf32>
    %cst_11 = arith.constant dense<0.000000e+00> : vector<8x1xf32>
    %35 = tpu.matmul %31, %18, %cst_11 {dimension_numbers = #tpu.dot_dimension_numbers<[1], [0], [0], [1], [0, 0, 1, 1], [], []>} : vector<8x64xf32>, vector<64x1xf32>, vector<8x1xf32> -> vector<8x1xf32>
    %36 = tpu.reciprocal %35 {approx = true} : vector<8x1xf32> -> vector<8x1xf32>
    %37 = arith.mulf %35, %36 : vector<8x1xf32>
    %cst_12 = arith.constant 2.000000e+00 : f32
    %38 = vector.broadcast %cst_12 : f32 to vector<8x1xf32>
    %39 = arith.subf %38, %37 : vector<8x1xf32>
    %40 = arith.mulf %36, %39 : vector<8x1xf32>
    %41 = vector.broadcast %40 : vector<8x1xf32> to vector<8x128xf32>
    %42 = arith.mulf %34, %41 : vector<8x128xf32>
    %c0_13 = arith.constant 0 : index
    %c0_14 = arith.constant 0 : index
    %43 = vector.load %arg5[%c0_13, %c0_14] : memref<8x128xf32, #tpu.memory_space<vmem>>, vector<8x128xf32>
    tpu.vector_store %arg5[%c0_13, %c0_14], %42 {strides = array<i32>} : memref<8x128xf32, #tpu.memory_space<vmem>>, vector<8x128xf32>,
    return
  }
  func.func @transform_0(%arg0: i32) -> (i32, i32) {
    %c0_i32 = arith.constant 0 : i32
    %c0_i32_0 = arith.constant 0 : i32
    return %arg0, %c0_i32 : i32, i32
  }
  func.func @transform_1(%arg0: i32) -> (i32, i32) {
    %c0_i32 = arith.constant 0 : i32
    %c0_i32_0 = arith.constant 0 : i32
    %c0_i32_1 = arith.constant 0 : i32
    return %c0_i32, %c0_i32_0 : i32, i32
  }
  func.func @transform_2(%arg0: i32) -> (i32, i32) {
    %c0_i32 = arith.constant 0 : i32
    %c0_i32_0 = arith.constant 0 : i32
    %c0_i32_1 = arith.constant 0 : i32
    return %c0_i32, %c0_i32_0 : i32, i32
  }
  func.func @transform_3(%arg0: i32) -> (i32, i32) {
    %c0_i32 = arith.constant 0 : i32
    %c0_i32_0 = arith.constant 0 : i32
    %c0_i32_1 = arith.constant 0 : i32
    return %c0_i32, %c0_i32_0 : i32, i32
  }
  func.func @transform_4(%arg0: i32) -> (i32, i32) {
    %c0_i32 = arith.constant 0 : i32
    %c0_i32_0 = arith.constant 0 : i32
    return %arg0, %c0_i32 : i32, i32
  }
}

</mosaic_0001>

<bundles_post_ra>
// kernel: tpu_custom_call.1
= control target key start
LH: loop header
LB: loop body
LE: loop exit
PB: predicated region body
PF: predicated region fallthrough
CT: control target
= control target key end

     0   :  { %s1256_s0 = inlined_call_operand.vmem [shape: s32[128,1], index: 0, kind: input, shape index: {}]   ;;  %s1257_s1 = inlined_call_operand.vmem [shape: f32[64,128], index: 1, kind: input, shape index: {}]   ;;  %s1258_s2 = inlined_call_operand.vmem [shape: f32[1,128], index: 2, kind: input, shape index: {}]   ;;  %s1259_s3 = inlined_call_operand.<no memory space> [shape: f32[1,1], index: 3, kind: input, shape index: {}]   ;;  %s1260_s4 = inlined_call_operand.hbm [shape: f32[16,128], index: 4, kind: output, shape index: {}]  }
   0x1   :  { %v9_v0 = vstv %s1259_s3 }
   0x2   :  { %10 = vst [vmem:[#allocation2] sm:$0x1] %v9_v0 }
   0x3   :  { %11 = vsyncpa [#allocation4], 0 }
   0x4   :  { %13 = vsyncpa [#allocation4 + $0x1], 0  ;;  %s1055_s17 = smov 0   ;;  %s1057_s18 = smov 0  }
   0x5   :  { %s1059_s19 = smov 0   ;;  %s1061_s20 = smov 0  }
   0x6 LB: > { %s1076_s3 = sadd.s32 4294967295, %s1020_s20   ;;  %s706_s21 = sadd.s32 4294967294, %s1020_s20   ;;  %s1020_s20 = sphi %s1061_s20, %s1266_s20   ;;  %s1016_s19 = sphi %s1059_s19, %s1265_s19   ;;  %s1012_s18 = sphi %s1057_s18, %s1264_s18   ;;  %s1008_s17 = sphi %s1055_s17, %s1263_s17  }
   0x7   : > { %s1080_s22 = sadd.s32 1, %s1020_s20   ;;  %s115_s23 = sadd.s32 1, %s1016_s19 }
   0x8   : > { %s112_s24 = ssub.s32 %s1020_s20, %s1080_s22  ;;  %p125_p0 = scmp.ne.s32.totalorder %s1016_s19, %s1012_s18 }
   0x9   : > { %p113_p1 = scmp.eq.s32.totalorder %s112_s24, 0  ;;  %p126_p2 = scmp.eq.s32.totalorder %s1076_s3, 1 }
   0xa   : > { %p131_p3 = scmp.ne.s32.totalorder %s1012_s18, %s1008_s17  ;;  %p132_p4 = scmp.eq.s32.totalorder %s706_s21, 1 }
   0xb   : > { %s1091_s25 = scalar_select %p113_p1, %s1016_s19, %s115_s23  }
   0xc   : > { %p1093_p5 = por %p126_p2, %p125_p0  ;;  %p1097_p6 = por %p132_p4, %p131_p3 }
   0xd   : > { %p709_p7 = scmp.ge.s32.totalorder %s1020_s20, 1  ;;  %p168_p8 = scmp.lt.s32.totalorder %s1020_s20, 3 }
   0xf   : > { %p169_p9 = pnand %p709_p7, %p168_p8 }
  0x10   : > { %s711_s28 = sshll.u32 (!%p169_p9), %s1076_s3, 3  ;;  %v258_v1 = vld [vmem:[%s1257_s1] sm:$0xff] (!%p169_p9)  ;;  %v259_v2 = vld [vmem:[%s1257_s1 + $0x8] sm:$0xff] (!%p169_p9)  ;;  %v260_v3 = vld [vmem:[%s1257_s1 + $0x10] sm:$0xff] (!%p169_p9)  ;;  %v1022_v4 = vmov (!%p169_p9), 0   ;;  %v208_v22 = vlaneseq (!%p169_p9)  ;;  %vm266_vm0 = vcmask (!%p169_p9), 523264  }
  0x11   : > { %172 = sbr.rel (%p169_p9) target bundleno = 942 (0x3ae), region = 36  ;;  %923 = vset.pattern.permute.xlu1 (!%p169_p9), %v1022_v4  ;;  %922 = vset.pattern.permute.xlu0 (!%p169_p9), %v1022_v4  ;;  %p195_p10 = scmp.lt.s32.totalorder (!%p169_p9), %s711_s28, 15  ;;  %v837_v5 = vpack.c.bf16 (!%p169_p9), %v259_v2, %v258_v1  ;;  %v261_v6 = vld [vmem:[%s1257_s1 + $0x18] sm:$0xff] (!%p169_p9)  ;;  %v262_v8 = vld [vmem:[%s1257_s1 + $0x20] sm:$0xff] (!%p169_p9)  ;;  %v263_v9 = vld [vmem:[%s1257_s1 + $0x28] sm:$0xff] (!%p169_p9)  ;;  %v1023_v26 = vmov (!%p169_p9), 0.0  }
  0x12   : > { %v841_v7 = vpack.c.bf16 (!%p169_p9), %v261_v6, %v260_v3  ;;  %v845_v10 = vpack.c.bf16 (!%p169_p9), %v263_v9, %v262_v8  ;;  %v264_v15 = vld [vmem:[%s1257_s1 + $0x30] sm:$0xff] (!%p169_p9)  ;;  %v265_v16 = vld [vmem:[%s1257_s1 + $0x38] sm:$0xff] (!%p169_p9)  ;;  %v1132_v23 = vand.u32 (!%p169_p9), 127, %v208_v22  ;;  %v427_v41 = vld [vmem:[#allocation2] sm:$0x1] (!%p169_p9)  ;;  %v1024_v59 = vmov (!%p169_p9), 0.0|0.0  }
  0x13   : > { %838 = vmatprep.subr.bf16.mxu0 (!%p169_p9), %v837_v5  ;;  %v849_v17 = vpack.c.bf16 (!%p169_p9), %v265_v16, %v264_v15  ;;  %877 = vpush (!%p169_p9), %v427_v41  ;;  %v729_v42 = vld [vmem:[%s1258_s2] ss:$0 sm:$0xff] (!%p169_p9)  ;;  %853 = vmatprep.subr.bf16.mxu1 (!%p169_p9), %v1024_v59  ;;  %vm1025_vm9 = vmmov (!%p169_p9), 0   ;;  %s191_s8 = sand.u32 (!%p169_p9), 1, %s1012_s18   ;;  %s734_s10 = sshll.u32 (!%p169_p9), %s1076_s3, 7 }
  0x14   : > { %840 = vmatpush3.bf16.msra.mxu0 (!%p169_p9), %v837_v5  ;;  %815 = vmatprep.mubr.msk.f32.mxu1 (!%p169_p9), %vm1025_vm9, %v1023_v26  ;;  %s710_s9 = sshll.u32 (!%p169_p9), %s191_s8, 3  ;;  %s634_s16 = scalar_lea.sflag (!%p169_p9), [#allocation4], %s191_s8 }
  0x15   : > { %842 = vmatprep.subr.bf16.mxu0 (!%p169_p9), %v841_v7  ;;  %s193_s11 = scalar_lea.vmem (!%p169_p9), [#allocation3], %s710_s9  ;;  %s1026_s3 = smov (!%p169_p9), [#allocation3]  }
  0x16   : > { %s647_s12 = sshll.u32 (!%p169_p9), %s193_s11, 4  ;;  %s1216_s12 = int_to_ptr.vmem [resolvable:$true] %s647_s12 }
  0x17   : > { %s958_s21 = scalar_lea.vmem (!%p169_p9), %s1216_s12, 128 }
  0x18   : > { %s1268_s28 = smov (!%p195_p10, %s711_s28), 15  ;;  %844 = vmatpush3.bf16.msra.mxu0 %v841_v7  ;;  %p959_p11 = scmp.ne.s32.totalorder %s1216_s12, %s958_s21 }
  0x19   : > { %s712_s15 = sshll.u32 %s1268_s28, 3  ;;  %846 = vmatprep.subr.bf16.mxu0 %v845_v10 }
  0x1a   : > { %s198_s23 = scalar_lea.vmem %s1256_s0, %s712_s15  ;;  %s1214_s15 = scalar_lea.hbm %s1260_s4, %s734_s10 }
  0x1b   : > { %v202_v11 = vld [vmem:[%s198_s23 + $0x10] sm:$0xff]  ;;  %v200_v12 = vld [vmem:[%s198_s23] sm:$0xff]  ;;  %v203_v13 = vld [vmem:[%s198_s23 + $0x18] sm:$0xff]  ;;  %p960_p12 = pnand %p959_p11, %p1093_p5 }
  0x1c   : > { %217 = vperm.xlu1 %923, %v202_v11   ;;  %211 = vperm.xlu0 %922, %v200_v12   ;;  %v201_v14 = vld [vmem:[%s198_s23 + $0x8] sm:$0xff]  ;;  %v204_v19 = vld [vmem:[%s198_s23 + $0x20] sm:$0xff]  ;;  %v207_v20 = vld [vmem:[%s198_s23 + $0x38] sm:$0xff] }
  0x1d   : > { %v205_v18 = vld [vmem:[%s198_s23 + $0x28] sm:$0xff]  ;;  %848 = vmatpush3.bf16.msra.mxu0 %v845_v10  ;;  %v206_v21 = vld [vmem:[%s198_s23 + $0x30] sm:$0xff]  ;;  %p961_p13 = pneg %p960_p12  ;;  %s962_s23 = sshll.u32 %s1026_s3, 4  ;;  %s963_s23 = int_to_ptr.vmem [resolvable:$false] %s962_s23 }
  0x1e   : > { %850 = vmatprep.subr.bf16.mxu0 %v849_v17  ;;  %s964_s24 = scalar_lea.vmem %s963_s23, 256  ;;  %p965_p0 = scmp.lt.s32.totalorder %s1216_s12, %s963_s23 }
  0x1f   : > { %p966_p1 = scmp.lt.s32.totalorder %s964_s24, %s958_s21 }
  0x20   : > { %220 = vperm.xlu1 %923, %v203_v13   ;;  %214 = vperm.xlu0 %922, %v201_v14  }
  0x21   : > { %852 = vmatpush3.bf16.msra.mxu0 %v849_v17  ;;  %p967_p2 = por %p966_p1, %p965_p0 }
  0x22   : > { %865 = vmatprep.subr.bf16.mxu0 %v1024_v59 }
  0x23   : > { %p968_p3 = pnand %p967_p2, %p961_p13 }
  0x24   : > { %226 = vperm.xlu1 %923, %v205_v18   ;;  %223 = vperm.xlu0 %922, %v204_v19  }
  0x28   : > { %232 = vperm.xlu1 %923, %v207_v20   ;;  %229 = vperm.xlu0 %922, %v206_v21  }
  0x44   : > { %s878_s7 = spop %877 }
  0x45   : > { %v429_v60 = vstv %s878_s7 }
  0x9b   : > { %v218_v24 = vpop.permute.xlu1 %217  ;;  %v212_v25 = vpop.permute.xlu0 %211 }
  0x9c   : > { %vm234_vm1 = vcmp.eq.s32.totalorder %v1132_v23, %v212_v25  ;;  %vm236_vm2 = vcmp.eq.s32.totalorder %v1132_v23, %v218_v24 }
  0x9d   : > { %v713_v27 = vsel %vm234_vm1, 1.0, %v1023_v26  ;;  %v715_v30 = vsel %vm236_vm2, 1.0, %v1023_v26 }
  0x9e   : > { %787 = vmatprep.mubr.msk.f32.mxu0 %vm266_vm0, %v713_v27 }
  0x9f   : > { %v221_v28 = vpop.permute.xlu1 %220  ;;  %v215_v29 = vpop.permute.xlu0 %214 }
  0xa0   : > { %vm235_vm3 = vcmp.eq.s32.totalorder %v1132_v23, %v215_v29  ;;  %vm237_vm4 = vcmp.eq.s32.totalorder %v1132_v23, %v221_v28 }
  0xa1   : > { %v714_v31 = vsel %vm235_vm3, 1.0, %v1023_v26  ;;  %v716_v34 = vsel %vm237_vm4, 1.0, %v1023_v26 }
  0xa2   : > { %788 = vmatmul.mubr.msk.f32.vlgmr.msra.gmra.mrb[0].mxu0 %vm266_vm0, %v714_v31 }
  0xa3   : > { %v227_v32 = vpop.permute.xlu1 %226  ;;  %790 = vmatprep.mubr.msk.f32.mxu0 %vm266_vm0, %v715_v30  ;;  %v224_v33 = vpop.permute.xlu0 %223 }
  0xa4   : > { %vm238_vm5 = vcmp.eq.s32.totalorder %v1132_v23, %v224_v33  ;;  %vm239_vm6 = vcmp.eq.s32.totalorder %v1132_v23, %v227_v32 }
  0xa5   : > { %v717_v35 = vsel %vm238_vm5, 1.0, %v1023_v26  ;;  %v718_v38 = vsel %vm239_vm6, 1.0, %v1023_v26 }
  0xa6   : > { %791 = vmatmul.mubr.msk.f32.gmra.mrb[2].mxu0 %vm266_vm0, %v716_v34 }
  0xa7   : > { %v233_v36 = vpop.permute.xlu1 %232  ;;  %793 = vmatprep.mubr.msk.f32.mxu0 %vm266_vm0, %v717_v35  ;;  %v230_v37 = vpop.permute.xlu0 %229 }
  0xa8   : > { %vm240_vm7 = vcmp.eq.s32.totalorder %v1132_v23, %v230_v37  ;;  %vm241_vm8 = vcmp.eq.s32.totalorder %v1132_v23, %v233_v36 }
  0xa9   : > { %v719_v39 = vsel %vm240_vm7, 1.0, %v1023_v26  ;;  %v720_v40 = vsel %vm241_vm8, 1.0, %v1023_v26 }
  0xaa   : > { %794 = vmatmul.mubr.msk.f32.gmra.mrb[4].mxu0 %vm266_vm0, %v718_v38  ;;  %v463_v38 = vshrl.u32 %v208_v22, 7 }
  0xab   : > { %796 = vmatprep.mubr.msk.f32.mxu0 %vm266_vm0, %v719_v39 }
  0xae   : > { %797 = vmatmul.mubr.msk.f32.gmra.mrb[6].mxu0 %vm266_vm0, %v720_v40  ;;  %v464_v40 = vmul.u32 8, %v463_v38 }
  0xaf   : > { %834 = vmatprep.mubr.msk.f32.mxu0 %vm1025_vm9, %v1023_v26 }
  0xb0   : > { %vm465_vm10 = vcmp.ge.s32.totalorder %v1132_v23, %v464_v40 }
 0x175   : > { %v1161_v43 = vpop.f32.mrb[0].mxu0 }
 0x176   : > { %v1163_v44 = vpop.f32.mrb[1].mxu0  ;;  %v404_v45 = vmul.f32 %v1161_v43, %v729_v42 }
 0x177   : > { %v403_v46 = vmul.f32 %v729_v42, %v1163_v44 }
 0x178   : > { %413 = vadd.xlane.f32.xlu1 %v404_v45 }
 0x179   : > { %411 = vadd.xlane.f32.xlu0 %v403_v46  ;;  %v1167_v47 = vpop.f32.mrb[2].mxu0  ;;  %v466_v46 = vadd.s32 8, %v464_v40 }
 0x17a   : > { %v1169_v48 = vpop.f32.mrb[3].mxu0  ;;  %v406_v49 = vmul.f32 %v1167_v47, %v729_v42 }
 0x17b   : > { %v405_v52 = vmul.f32 %v729_v42, %v1169_v48  ;;  %vm467_vm11 = vcmp.lt.s32.totalorder %v1132_v23, %v466_v46 }
 0x17c   : > { %vm468_vm12 = vmand %vm465_vm10, %vm467_vm11 }
 0x17d   : > { %417 = vadd.xlane.f32.xlu0 %v406_v49  ;;  %v1172_v50 = vpop.f32.mrb[4].mxu0 }
 0x17e   : > { %v1174_v51 = vpop.f32.mrb[5].mxu0  ;;  %v408_v56 = vmul.f32 %v1172_v50, %v729_v42 }
 0x17f   : > { %v407_v53 = vmul.f32 %v729_v42, %v1174_v51 }
 0x181   : > { %415 = vadd.xlane.f32.xlu0 %v405_v52  ;;  %419 = vadd.xlane.f32.xlu1 %v407_v53  ;;  %v1178_v54 = vpop.f32.mrb[6].mxu0 }
 0x182   : > { %v1180_v55 = vpop.f32.mrb[7].mxu0  ;;  %v410_v58 = vmul.f32 %v1178_v54, %v729_v42 }
 0x183   : > { %v409_v57 = vmul.f32 %v729_v42, %v1180_v55 }
 0x185   : > { %421 = vadd.xlane.f32.xlu0 %v408_v56  ;;  %423 = vadd.xlane.f32.xlu1 %v409_v57 }
 0x189   : > { %425 = vadd.xlane.f32.xlu0 %v410_v58 }
 0x205   : > { %v414_v61 = vpop.xlane.xlu1 %413 }
 0x206   : > { %v431_v62 = vadd.f32 %v429_v60, %v414_v61  ;;  %v412_v63 = vpop.xlane.xlu0 %411 }
 0x207   : > { %v430_v0 = vadd.f32 %v429_v60, %v412_v63 }
 0x208   : > { %924 = vtanh.f32 %v431_v62 }
 0x209   : > { %926 = vtanh.f32 %v430_v0 }
 0x20a   : > { %v418_v1 = vpop.xlane.xlu0 %417 }
 0x20b   : > { %v433_v2 = vadd.f32 %v429_v60, %v418_v1 }
 0x20d   : > { %928 = vtanh.f32 %v433_v2 }
 0x20e   : > { %v420_v3 = vpop.xlane.xlu1 %419  ;;  %v416_v4 = vpop.xlane.xlu0 %415 }
 0x20f   : > { %v434_v5 = vadd.f32 %v429_v60, %v420_v3  ;;  %v432_v6 = vadd.f32 %v429_v60, %v416_v4 }
 0x211   : > { %930 = vtanh.f32 %v434_v5 }
 0x212   : > { %v925_v7 = vpop.eup %924  ;;  %932 = vtanh.f32 %v432_v6  ;;  %v424_v8 = vpop.xlane.xlu1 %423 }
 0x213   : > { %v422_v9 = vpop.xlane.xlu0 %421  ;;  %v927_v10 = vpop.eup %926  ;;  %v448_v11 = vmul.f32 1.442695, %v925_v7  ;;  %v436_v12 = vadd.f32 %v429_v60, %v424_v8 }
 0x214   : > { %v446_v13 = vmul.f32 1.442695, %v927_v10  ;;  %v435_v14 = vadd.f32 %v429_v60, %v422_v9 }
 0x215   : > { %934 = vpow2.f32 %v448_v11 }
 0x216   : > { %936 = vpow2.f32 %v446_v13 }
 0x217   : > { %v426_v15 = vpop.xlane.xlu0 %425  ;;  %v929_v16 = vpop.eup %928  ;;  %938 = vtanh.f32 %v436_v12 }
 0x218   : > { %v437_v17 = vadd.f32 %v429_v60, %v426_v15  ;;  %940 = vtanh.f32 %v435_v14  ;;  %v452_v18 = vmul.f32 1.442695, %v929_v16 }
 0x21a   : > { %942 = vtanh.f32 %v437_v17 }
 0x21b   : > { %v931_v19 = vpop.eup %930  ;;  %944 = vpow2.f32 %v452_v18 }
 0x21c   : > { %v933_v20 = vpop.eup %932  ;;  %v454_v25 = vmul.f32 1.442695, %v931_v19 }
 0x21d   : > { %v450_v21 = vmul.f32 1.442695, %v933_v20 }
 0x21f   : > { %v935_v24 = vpop.eup %934  ;;  %946 = vpow2.f32 %v450_v21 }
 0x220   : > { %v937_v27 = vpop.eup %936  ;;  %v472_v28 = vmul.f32 %v935_v24, %v1161_v43  ;;  %948 = vpow2.f32 %v454_v25 }
 0x221   : > { %v939_v29 = vpop.eup %938  ;;  %v866_v30 = vpack.c.bf16 %v935_v24, %v937_v27  ;;  %v471_v31 = vmul.f32 %v937_v27, %v1163_v44 }
 0x222   : > { %v941_v32 = vpop.eup %940  ;;  %v458_v33 = vmul.f32 1.442695, %v939_v29 }
 0x223   : > { %v456_v35 = vmul.f32 1.442695, %v941_v32  ;;  %867 = vmatpush3.bf16.msra.mxu0 %v866_v30  ;;  %v854_v36 = vpack.c.bf16 %v472_v28, %v471_v31 }
 0x224   : > { %v943_v34 = vpop.eup %942  ;;  %950 = vpow2.f32 %v458_v33  ;;  %868 = vmatprep.subr.bf16.mxu0 %v1024_v59 }
 0x225   : > { %v460_v37 = vmul.f32 1.442695, %v943_v34  ;;  %952 = vpow2.f32 %v456_v35  ;;  %855 = vmatpush3.bf16.msra.mxu1 %v854_v36  ;;  %v945_v39 = vpop.eup %944 }
 0x226   : > { %856 = vmatprep.subr.bf16.mxu1 %v1024_v59  ;;  %v474_v44 = vmul.f32 %v945_v39, %v1167_v47 }
 0x227   : > { %954 = vpow2.f32 %v460_v37 }
 0x229   : > { %v947_v41 = vpop.eup %946 }
 0x22a   : > { %v869_v42 = vpack.c.bf16 %v945_v39, %v947_v41  ;;  %v473_v43 = vmul.f32 %v947_v41, %v1169_v48  ;;  %v949_v49 = vpop.eup %948 }
 0x22b   : > { %v475_v57 = vmul.f32 %v949_v49, %v1174_v51 }
 0x22c   : > { %870 = vmatpush3.bf16.msra.mxu0 %v869_v42  ;;  %v857_v45 = vpack.c.bf16 %v474_v44, %v473_v43 }
 0x22d   : > { %871 = vmatprep.subr.bf16.mxu0 %v1024_v59 }
 0x22e   : > { %v951_v22 = vpop.eup %950  ;;  %858 = vmatpush3.bf16.msra.mxu1 %v857_v45 }
 0x22f   : > { %v953_v52 = vpop.eup %952  ;;  %859 = vmatprep.subr.bf16.mxu1 %v1024_v59  ;;  %v477_v47 = vmul.f32 %v951_v22, %v1180_v55 }
 0x230   : > { %v872_v56 = vpack.c.bf16 %v953_v52, %v949_v49  ;;  %v476_v48 = vmul.f32 %v953_v52, %v1172_v50  ;;  %v730_v50 = vsel %vm468_vm12, 1.0, %v1023_v26 }
 0x231   : > { %v955_v53 = vpop.eup %954 }
 0x232   : > { %v478_v58 = vmul.f32 %v955_v53, %v1178_v54  ;;  %873 = vmatpush3.bf16.msra.mxu0 %v872_v56  ;;  %v860_v60 = vpack.c.bf16 %v476_v48, %v475_v57  ;;  %v875_v61 = vpack.c.bf16 %v955_v53, %v951_v22 }
 0x233   : > { %874 = vmatprep.subr.bf16.mxu0 %v1024_v59 }
 0x234   : > { %v863_v62 = vpack.c.bf16 %v478_v58, %v477_v47  ;;  %861 = vmatpush3.bf16.msra.mxu1 %v860_v60 }
 0x235   : > { %862 = vmatprep.subr.bf16.mxu1 %v1024_v59 }
 0x236   : > { %876 = vmatpush3.bf16.msra.mxu0 %v875_v61 }
 0x238   : > { %864 = vmatpush3.bf16.msra.mxu1 %v863_v62 }
 0x239   : > { %835 = vmatmul.mubr.msk.f32.vlgmr.msra.gmra.mrb[8].mxu0 %vm266_vm0, %v730_v50 }
 0x23b   : > { %816 = vmatmul.mubr.msk.f32.vlgmr.msra.gmra.mrb[0].mxu1 %vm266_vm0, %v730_v50 }
 0x30c   : > { %v618_v23 = vpop.f32.mrb[8].mxu0 }
 0x30d   : > { %956 = vrcp.f32 %v618_v23  ;;  %v836_v51 = vpop.f32.mrb[9].mxu0 }
 0x30e   : > { %v548_v1 = vpop.f32.mrb[0].mxu1 }
 0x30f   : > { %v817_v59 = vpop.f32.mrb[1].mxu1 }
 0x317   : > { %v957_v54 = vpop.eup %956 }
 0x318   : > { %v623_v55 = vmul.f32 %v957_v54, %v618_v23 }
 0x31a   : > { %v624_v63 = vsub.f32 2.0, %v623_v55 }
 0x31c   : > { %v625_v0 = vmul.f32 %v957_v54, %v624_v63 }
 0x31e   : > { %628 = vperm.xlu1 %923, %v625_v0  }
 0x39d   : > { %v629_v26 = vpop.permute.xlu1 %628 }
 0x39e   : > { %v631_v2 = vmul.f32 %v629_v26, %v548_v1 }
 0x3a0   : > { %632 = vst [vmem:[%s193_s11] sm:$0xff] %v631_v2 }
 0x3a1   : > { %971 = shalt.err (!%p968_p3)
}
 0x3a2   : > { %s972_s29 = scalar_lea.hbm %s1214_s15, 128  ;;  %s976_s5 = scalar_lea.hbm %s1260_s4, 256 }
 0x3a3   : > { %p973_p4 = scmp.ne.s32.totalorder %s1214_s15, %s972_s29  ;;  %p977_p9 = scmp.lt.u32.totalorder %s1214_s15, %s1260_s4 }
 0x3a4   : > { %p978_p10 = scmp.lt.u32.totalorder %s976_s5, %s972_s29  ;;  %p980_p12 = scmp.lt.u32.totalorder %s972_s29, %s1214_s15 }
 0x3a5   : > { %p974_p7 = pnand %p973_p4, %p1093_p5 }
 0x3a6   : > { %p979_p11 = por %p978_p10, %p977_p9 }
 0x3a7   : > { %p975_p8 = pneg %p974_p7 }
 0x3a8   : > { %p981_p13 = por %p980_p12, %p979_p11 }
 0x3aa   : > { %p982_p0 = pnand %p981_p13, %p975_p8 }
 0x3ac   : > { %985 = shalt.err (!%p982_p0)
}
 0x3ad   : > { %879 = dma.vmem_to_hbm [thread:$0]  (%p1093_p5), %s1216_s12, 128, %s1214_s15, %s634_s16  }
 0x3ae PF: > { %p885_p1 = scmp.ge.s32.totalorder %s1020_s20, 2  ;;  %s659_s8 = sand.u32 1, %s1008_s17  }
 0x3af   : > { %s660_s9 = scalar_lea.sflag [#allocation4], %s659_s8 }
 0x3b0   : > { %p882_p2 = pnand %p885_p1, %p1097_p6 }
 0x3b2   : > { %1003 = dma.done.wait (!%p882_p2), %s660_s9, 128  }
 0x3b3   : > { %1005 = vsyncadd (!%p882_p2), %s660_s9, 4294967168  ;;  %p16_p3 = scmp.ge.s32.totalorder %s1080_s22, 4   ;;  %s1263_s17 = smov %s1012_s18 }
 0x3b4   : > { %s1264_s18 = smov %s1016_s19  ;;  %s1265_s19 = smov %s1091_s25 }
 0x3b5   : > { %s1266_s20 = smov %s1080_s22  ;;  %18 = sbr.rel (!%p16_p3) target bundleno = 6 (0x6), region = 71 }
 0x3bc   :  { %665 = vsyncpa [#allocation4], 1 }
 0x3bd   :  { %667 = vsyncpa [#allocation4 + $0x1], 1 }

</bundles_post_ra>
